<compile_context>
chip_gen: v5e
topology: v5e:2x2
jax: 0.10.0
libtpu: 0.0.40
codegen_flags: <defaults>
</compile_context>

<pallas_src>
import functools

import jax
import jax.numpy as jnp
from jax import lax
from jax.experimental import pallas as pl
from jax.experimental.pallas import tpu as pltpu

_LANES = 128


def _round_up(x, m):
    return ((x + m - 1) // m) * m


def _vmem_budget_bytes():
    """Generation-aware VMEM budget (~48 MiB on v7x, ~96 MiB on v5e/v6e)."""
    try:
        cap = int(pltpu.get_tpu_info().vmem_capacity_bytes)
    except Exception:
        cap = 64 * 1024 * 1024          # conservative: v7x per-TC VMEM
    return (cap * 3) // 4


def _make_kernel(*, n_real, t, resident, needs_valid):
    groups = t // _LANES

    def fold_lanes(x):
        """(t, t) f32 -> (t, 128): add the t/128 lane groups (VPU adds only)."""
        acc = x[:, 0:_LANES]
        for g in range(1, groups):
            acc = acc + x[:, g * _LANES:(g + 1) * _LANES]
        return acc

    def kernel(f_row_ref, f_colt_ref, lab_rows_ref, lab_cols_ref, out_ref,
               pos_acc, neg_acc):
        ri = pl.program_id(0)
        ci = pl.program_id(1)

        @pl.when(ci == 0)
        def _init():
            pos_acc[...] = jnp.zeros_like(pos_acc)
            neg_acc[...] = jnp.zeros_like(neg_acc)

        # Column operand (d_pad, t): leading-axis index into the pre-transposed
        # feature slab (fully VMEM-resident, or a streamed per-ci block).
        f_col = f_colt_ref[ci] if resident else f_colt_ref[0]

        # (t, t) similarity tile: standard (m,k)@(k,n) on the MXU, f32 acc.
        sim = jnp.dot(f_row_ref[...], f_col, preferred_element_type=jnp.float32)
        sim = jnp.clip(sim, -20.0, 20.0)
        e = jnp.exp(sim)                                        # f32, EUP

        # Cheap (t,1)/(1,t) index vectors; masks come from broadcast compares.
        row_ids = ri * t + lax.broadcasted_iota(jnp.int32, (t, 1), 0)
        col_ids = ci * t + lax.broadcasted_iota(jnp.int32, (1, t), 1)

        if needs_valid:                       # only emitted when padding exists
            e = jnp.where(col_ids < n_real, e, 0.0)     # zero padded columns

        # lab_rows_ref: labels of the ROW tile (t,1); lab_cols_ref: labels of
        # the COLUMN tile (1,t).
        same = lab_rows_ref[...] == lab_cols_ref[...]
        pos_tile = jnp.where(same & (row_ids != col_ids), e, 0.0)
        neg_tile = jnp.where(same, 0.0, e)

        # Lane-group folds (VPU) into (t, 128) accumulators; the XLU cross-lane
        # reduce happens once per row block in the epilogue.
        pos_acc[...] += fold_lanes(pos_tile)
        neg_acc[...] += fold_lanes(neg_tile)

        @pl.when(ci == pl.num_programs(1) - 1)
        def _finish():
            num = jnp.sum(pos_acc[...], axis=1, keepdims=True) + 1e-10
            den = jnp.sum(neg_acc[...], axis=1, keepdims=True) + 1e-10
            # NOTE: rows with a unique label get num == 1e-10 -> log(1e-10)
            # ~ -23 per row; this matches the PyTorch reference exactly.
            out_ref[...] = jnp.log(num) - jnp.log(den)

    return kernel


@functools.partial(jax.jit,
                   static_argnames=("block", "matmul_dtype", "column_resident"))
def contrastive_loss(features, labels, *, block=512,
                     matmul_dtype=jnp.bfloat16, column_resident=None):
    """Pallas TPU equivalent of ContrastiveLoss.forward(features, labels)."""
    n, d = features.shape

    # Tile policy: t is always a multiple of 128 (lane/MXU aligned; the label
    # blocks and the (t,128) lane-fold rely on it).  For n > block this keeps
    # >= 2 row blocks so the "parallel" axis can use both v7x TensorCores.
    t = _round_up(block, _LANES) if n > block else _round_up(n, _LANES)
    n_pad = _round_up(n, t)
    d_pad = _round_up(d, _LANES)
    n_row_blocks = n_pad // t
    n_col_blocks = n_pad // t

    # VMEM budgeting / residency decision (pipeline double-buffers inputs).
    feat_bytes = jnp.dtype(matmul_dtype).itemsize
    budget = _vmem_budget_bytes()
    fixed = 2 * t * d_pad * feat_bytes            # row feature tiles (x2 bufs)
    fixed += 2 * t * _LANES * 4                   # pos/neg accumulators
    fixed += 4 * (t + 1) * 4 + (2 << 20)          # labels/out blocks + slack
    stream_cost = fixed + 2 * t * d_pad * feat_bytes
    resident_cost = fixed + 2 * n_pad * d_pad * feat_bytes
    if column_resident is None:
        resident = resident_cost <= budget
    else:
        resident = bool(column_resident)
    used = resident_cost if resident else stream_cost
    vmem_limit = min(max(budget, used), 127 * 1024 * 1024)

    # Pad features / labels; bf16 (or f32) MXU operands, f32 accumulation.
    f32 = features.astype(jnp.float32)
    f_pad = (jnp.zeros((n_pad, d_pad), jnp.float32)
             .at[:n, :d].set(f32).astype(matmul_dtype))
    # Column operand pre-transposed once in XLA -> (C, d_pad, t) slab: the
    # kernel does a standard (m,k)@(k,n) matmul with no per-tile transpose.
    f_colt = f_pad.reshape(n_col_blocks, t, d_pad).transpose(0, 2, 1)

    lab_pad = jnp.full((n_pad,), -1, jnp.int32).at[:n].set(labels.astype(jnp.int32))
    lab_rows = lab_pad.reshape(n_pad, 1)      # row-tile labels (column vector)
    lab_cols = lab_pad.reshape(1, n_pad)      # column-tile labels (row vector)

    if resident:
        col_spec = pl.BlockSpec((n_col_blocks, d_pad, t), lambda ri, ci: (0, 0, 0))
    else:
        col_spec = pl.BlockSpec((1, d_pad, t), lambda ri, ci: (ci, 0, 0))

    kernel = _make_kernel(n_real=n, t=t, resident=resident,
                          needs_valid=(n_pad != n))

    per_row = pl.pallas_call(
        kernel,
        out_shape=jax.ShapeDtypeStruct((n_pad, 1), jnp.float32),
        grid_spec=pltpu.PrefetchScalarGridSpec(
            num_scalar_prefetch=0,
            grid=(n_row_blocks, n_col_blocks),
            in_specs=[
                pl.BlockSpec((t, d_pad), lambda ri, ci: (ri, 0)),   # row features
                col_spec,                                           # colT features
                pl.BlockSpec((t, 1), lambda ri, ci: (ri, 0)),       # row labels
                pl.BlockSpec((1, t), lambda ri, ci: (0, ci)),       # col labels
            ],
            out_specs=pl.BlockSpec((t, 1), lambda ri, ci: (ri, 0)),
            scratch_shapes=[
                pltpu.VMEM((t, _LANES), jnp.float32),   # positive-sum accumulator
                pltpu.VMEM((t, _LANES), jnp.float32),   # negative-sum accumulator
            ],
        ),
        compiler_params=pltpu.CompilerParams(
            dimension_semantics=("parallel", "arbitrary"),
            vmem_limit_bytes=vmem_limit,
        ),
    )(f_pad, f_colt, lab_rows, lab_cols)

    # Per-row log(num+1e-10) - log(den+1e-10); padded rows are garbage by
    # design and are dropped here; mean + negation in the wrapper.
    return -jnp.mean(per_row[:n, 0])


def _reference_loss(features, labels):
    # Pure-JAX reference mirroring the PyTorch forward, for verification.
    features = features.astype(jnp.float32)
    sim = jnp.clip(features @ features.T, -20.0, 20.0)
    n = features.shape[0]
    eye = jnp.eye(n, dtype=bool)
    labels_mask = (labels[None, :] == labels[:, None]).astype(jnp.float32)
    positives = labels_mask * (~eye).astype(jnp.float32)
    negatives = 1.0 - labels_mask
    e = jnp.exp(sim)
    num = jnp.sum(e * positives, axis=1, keepdims=True) + 1e-10
    den = jnp.sum(e * negatives, axis=1, keepdims=True) + 1e-10
    return -jnp.mean(jnp.log(num / den))


if __name__ == "__main__":
    key = jax.random.PRNGKey(0)
    k1, k2, k3, k4 = jax.random.split(key, 4)

    # Small shapes implied by the module: batch of 8 feature rows, hidden 32.
    N, D = 8, 32
    feats = jax.random.normal(k1, (N, D), dtype=jnp.float32)
    labs = jax.random.randint(k2, (N,), 0, 4, dtype=jnp.int32)

    ref = _reference_loss(feats, labs)
    loss_f32 = contrastive_loss(feats, labs, matmul_dtype=jnp.float32)
    loss_bf16 = contrastive_loss(feats, labs)          # default bf16 MXU path
    jax.block_until_ready((loss_f32, loss_bf16))
    assert jnp.allclose(loss_f32, ref, rtol=1e-5, atol=1e-5), (loss_f32, ref)
    assert jnp.allclose(loss_bf16, ref, rtol=5e-2, atol=5e-2), (loss_bf16, ref)

    # Larger case: N/D padding + validity masking; with block=128 a real (3,3)
    # grid (multi-step accumulation, diagonal blocks, parallel row axis) is
    # exercised for both the resident and the streamed column-operand paths.
    N2, D2 = 300, 200
    feats2 = jax.random.normal(k3, (N2, D2), dtype=jnp.float32) * 0.3
    labs2 = jax.random.randint(k4, (N2,), 0, 10, dtype=jnp.int32)
    ref2 = _reference_loss(feats2, labs2)

    loss2 = contrastive_loss(feats2, labs2, matmul_dtype=jnp.float32)
    loss2_grid = contrastive_loss(feats2, labs2, block=128,
                                  matmul_dtype=jnp.float32)
    loss2_stream = contrastive_loss(feats2, labs2, block=128,
                                    matmul_dtype=jnp.float32,
                                    column_resident=False)
    jax.block_until_ready((loss2, loss2_grid, loss2_stream))
    assert jnp.allclose(loss2, ref2, rtol=1e-4, atol=1e-4), (loss2, ref2)
    assert jnp.allclose(loss2_grid, ref2, rtol=1e-4, atol=1e-4), (loss2_grid, ref2)
    assert jnp.allclose(loss2_stream, ref2, rtol=1e-4, atol=1e-4), (loss2_stream, ref2)

    print("KERNEL_OK")
</pallas_src>

<mosaic_0001>
module attributes {stable_mosaic.version = 11 : i64} {
  func.func @kernel(%arg0: i32, %arg1: i32, %arg2: memref<128x128xf32, #tpu.memory_space<vmem>>, %arg3: memref<1x128x128xf32, #tpu.memory_space<vmem>>, %arg4: memref<128x1xi32, #tpu.memory_space<vmem>>, %arg5: memref<1x128xi32, #tpu.memory_space<vmem>>, %arg6: memref<128x1xf32, #tpu.memory_space<vmem>>, %arg7: memref<128x128xf32, #tpu.memory_space<vmem>>, %arg8: memref<128x128xf32, #tpu.memory_space<vmem>>) attributes {dimension_semantics = [#tpu.dimension_semantics<parallel>, #tpu.dimension_semantics<arbitrary>], iteration_bounds = array<i64: 1, 1>, scalar_prefetch = 0 : i64, scratch_operands = 2 : i64, tpu.core_type = #tpu.core_type<tc>, window_params = [{transform_indices = @transform_0, window_bounds = array<i64: 128, 128>}, {pipeline_mode = #tpu.pipeline_mode<synchronous>, transform_indices = @transform_1, window_bounds = array<i64: 1, 128, 128>}, {transform_indices = @transform_2, window_bounds = array<i64: 128, 1>}, {transform_indices = @transform_3, window_bounds = array<i64: 1, 128>}, {transform_indices = @transform_4, window_bounds = array<i64: 128, 1>}]} {
    %c0_i32 = arith.constant 0 : i32
    %0 = arith.cmpi eq, %arg1, %c0_i32 : i32
    %1 = arith.extui %0 : i1 to i32
    %c0_i32_0 = arith.constant 0 : i32
    %2 = arith.cmpi ne, %1, %c0_i32_0 : i32
    scf.if %2 {
      %cst_24 = arith.constant 0.000000e+00 : f32
      %49 = vector.broadcast %cst_24 : f32 to vector<128x128xf32>
      %c0_25 = arith.constant 0 : index
      %c0_26 = arith.constant 0 : index
      %50 = vector.load %arg7[%c0_25, %c0_26] : memref<128x128xf32, #tpu.memory_space<vmem>>, vector<128x128xf32>
      tpu.vector_store %arg7[%c0_25, %c0_26], %49 {strides = array<i32>} : memref<128x128xf32, #tpu.memory_space<vmem>>, vector<128x128xf32>,
      %cst_27 = arith.constant 0.000000e+00 : f32
      %51 = vector.broadcast %cst_27 : f32 to vector<128x128xf32>
      %c0_28 = arith.constant 0 : index
      %c0_29 = arith.constant 0 : index
      %52 = vector.load %arg8[%c0_28, %c0_29] : memref<128x128xf32, #tpu.memory_space<vmem>>, vector<128x128xf32>
      tpu.vector_store %arg8[%c0_28, %c0_29], %51 {strides = array<i32>} : memref<128x128xf32, #tpu.memory_space<vmem>>, vector<128x128xf32>,
    } else {
    }
    %3 = arith.index_cast %arg1 : i32 to index
    %c0 = arith.constant 0 : index
    %c0_1 = arith.constant 0 : index
    %4 = vector.load %arg3[%3, %c0, %c0_1] : memref<1x128x128xf32, #tpu.memory_space<vmem>>, vector<1x128x128xf32>
    %5 = vector.shape_cast %4 : vector<1x128x128xf32> to vector<128x128xf32>
    %c0_2 = arith.constant 0 : index
    %c0_3 = arith.constant 0 : index
    %6 = vector.load %arg2[%c0_2, %c0_3] : memref<128x128xf32, #tpu.memory_space<vmem>>, vector<128x128xf32>
    %cst = arith.constant dense<0.000000e+00> : vector<128x128xf32>
    %7 = tpu.matmul %6, %5, %cst {dimension_numbers = #tpu.dot_dimension_numbers<[1], [0], [0], [1], [0, 0, 1, 1], [], []>} : vector<128x128xf32>, vector<128x128xf32>, vector<128x128xf32> -> vector<128x128xf32>
    %cst_4 = arith.constant -2.000000e+01 : f32
    %cst_5 = arith.constant 2.000000e+01 : f32
    %8 = vector.broadcast %cst_4 : f32 to vector<128x128xf32>
    %9 = arith.maximumf %8, %7 : vector<128x128xf32>
    %10 = vector.broadcast %cst_5 : f32 to vector<128x128xf32>
    %11 = arith.minimumf %10, %9 : vector<128x128xf32>
    %12 = math.exp %11 : vector<128x128xf32>
    %c128_i32 = arith.constant 128 : i32
    %13 = arith.muli %arg0, %c128_i32 : i32
    %14 = tpu.iota {dimensions = array<i32: 0>} : vector<128x1xi32>
    %15 = vector.broadcast %13 : i32 to vector<128x1xi32>
    %16 = arith.addi %15, %14 : vector<128x1xi32>
    %c128_i32_6 = arith.constant 128 : i32
    %17 = arith.muli %arg1, %c128_i32_6 : i32
    %18 = tpu.iota {dimensions = array<i32: 1>} : vector<1x128xi32>
    %19 = vector.broadcast %17 : i32 to vector<1x128xi32>
    %20 = arith.addi %19, %18 : vector<1x128xi32>
    %c8_i32 = arith.constant 8 : i32
    %21 = vector.broadcast %c8_i32 : i32 to vector<1x128xi32>
    %22 = arith.cmpi slt, %20, %21 : vector<1x128xi32>
    %cst_7 = arith.constant 0.000000e+00 : f32
    %23 = vector.shape_cast %22 : vector<1x128xi1> to vector<1x128xi1>
    %24 = vector.broadcast %23 : vector<1x128xi1> to vector<128x128xi1>
    %25 = vector.broadcast %cst_7 : f32 to vector<128x128xf32>
    %26 = arith.select %24, %12, %25 : vector<128x128xi1>, vector<128x128xf32>
    %c0_8 = arith.constant 0 : index
    %c0_9 = arith.constant 0 : index
    %27 = vector.load %arg4[%c0_8, %c0_9] : memref<128x1xi32, #tpu.memory_space<vmem>>, vector<128x1xi32>
    %c0_10 = arith.constant 0 : index
    %c0_11 = arith.constant 0 : index
    %28 = vector.load %arg5[%c0_10, %c0_11] : memref<1x128xi32, #tpu.memory_space<vmem>>, vector<1x128xi32>
    %29 = vector.broadcast %27 : vector<128x1xi32> to vector<128x128xi32>
    %30 = vector.broadcast %28 : vector<1x128xi32> to vector<128x128xi32>
    %31 = arith.cmpi eq, %29, %30 : vector<128x128xi32>
    %32 = vector.broadcast %16 : vector<128x1xi32> to vector<128x128xi32>
    %33 = vector.broadcast %20 : vector<1x128xi32> to vector<128x128xi32>
    %34 = arith.cmpi ne, %32, %33 : vector<128x128xi32>
    %35 = arith.andi %31, %34 : vector<128x128xi1>
    %cst_12 = arith.constant 0.000000e+00 : f32
    %36 = vector.broadcast %cst_12 : f32 to vector<128x128xf32>
    %37 = arith.select %35, %26, %36 : vector<128x128xi1>, vector<128x128xf32>
    %cst_13 = arith.constant 0.000000e+00 : f32
    %38 = vector.broadcast %cst_13 : f32 to vector<128x128xf32>
    %39 = arith.select %31, %38, %26 : vector<128x128xi1>, vector<128x128xf32>
    %c0_14 = arith.constant 0 : index
    %c0_15 = arith.constant 0 : index
    %40 = vector.load %arg7[%c0_14, %c0_15] : memref<128x128xf32, #tpu.memory_space<vmem>>, vector<128x128xf32>
    %41 = arith.addf %40, %37 : vector<128x128xf32>
    %c0_16 = arith.constant 0 : index
    %c0_17 = arith.constant 0 : index
    %42 = vector.load %arg7[%c0_16, %c0_17] : memref<128x128xf32, #tpu.memory_space<vmem>>, vector<128x128xf32>
    tpu.vector_store %arg7[%c0_16, %c0_17], %41 {strides = array<i32>} : memref<128x128xf32, #tpu.memory_space<vmem>>, vector<128x128xf32>,
    %c0_18 = arith.constant 0 : index
    %c0_19 = arith.constant 0 : index
    %43 = vector.load %arg8[%c0_18, %c0_19] : memref<128x128xf32, #tpu.memory_space<vmem>>, vector<128x128xf32>
    %44 = arith.addf %43, %39 : vector<128x128xf32>
    %c0_20 = arith.constant 0 : index
    %c0_21 = arith.constant 0 : index
    %45 = vector.load %arg8[%c0_20, %c0_21] : memref<128x128xf32, #tpu.memory_space<vmem>>, vector<128x128xf32>
    tpu.vector_store %arg8[%c0_20, %c0_21], %44 {strides = array<i32>} : memref<128x128xf32, #tpu.memory_space<vmem>>, vector<128x128xf32>,
    %c0_i32_22 = arith.constant 0 : i32
    %46 = arith.cmpi eq, %arg1, %c0_i32_22 : i32
    %47 = arith.extui %46 : i1 to i32
    %c0_i32_23 = arith.constant 0 : i32
    %48 = arith.cmpi ne, %47, %c0_i32_23 : i32
    scf.if %48 {
      %c0_24 = arith.constant 0 : index
      %c0_25 = arith.constant 0 : index
      %49 = vector.load %arg7[%c0_24, %c0_25] : memref<128x128xf32, #tpu.memory_space<vmem>>, vector<128x128xf32>
      %cst_26 = arith.constant dense<0.000000e+00> : vector<128xf32>
      %50 = vector.multi_reduction <add>, %49, %cst_26 [1] : vector<128x128xf32> to vector<128xf32>
      %51 = vector.shape_cast %50 : vector<128xf32> to vector<128x1xf32>
      %cst_27 = arith.constant 1.000000e-10 : f32
      %52 = vector.broadcast %cst_27 : f32 to vector<128x1xf32>
      %53 = arith.addf %51, %52 : vector<128x1xf32>
      %c0_28 = arith.constant 0 : index
      %c0_29 = arith.constant 0 : index
      %54 = vector.load %arg8[%c0_28, %c0_29] : memref<128x128xf32, #tpu.memory_space<vmem>>, vector<128x128xf32>
      %cst_30 = arith.constant dense<0.000000e+00> : vector<128xf32>
      %55 = vector.multi_reduction <add>, %54, %cst_30 [1] : vector<128x128xf32> to vector<128xf32>
      %56 = vector.shape_cast %55 : vector<128xf32> to vector<128x1xf32>
      %cst_31 = arith.constant 1.000000e-10 : f32
      %57 = vector.broadcast %cst_31 : f32 to vector<128x1xf32>
      %58 = arith.addf %56, %57 : vector<128x1xf32>
      %59 = math.log %53 : vector<128x1xf32>
      %60 = math.log %58 : vector<128x1xf32>
      %61 = arith.subf %59, %60 : vector<128x1xf32>
      %c0_32 = arith.constant 0 : index
      %c0_33 = arith.constant 0 : index
      %62 = vector.load %arg6[%c0_32, %c0_33] : memref<128x1xf32, #tpu.memory_space<vmem>>, vector<128x1xf32>
      tpu.vector_store %arg6[%c0_32, %c0_33], %61 {strides = array<i32>} : memref<128x1xf32, #tpu.memory_space<vmem>>, vector<128x1xf32>,
    } else {
    }
    return
  }
  func.func @transform_0(%arg0: i32, %arg1: i32) -> (i32, i32) {
    %c0_i32 = arith.constant 0 : i32
    %c0_i32_0 = arith.constant 0 : i32
    return %arg0, %c0_i32 : i32, i32
  }
  func.func @transform_1(%arg0: i32, %arg1: i32) -> (i32, i32, i32) {
    %c0_i32 = arith.constant 0 : i32
    %c0_i32_0 = arith.constant 0 : i32
    %c0_i32_1 = arith.constant 0 : i32
    %c0_i32_2 = arith.constant 0 : i32
    return %c0_i32, %c0_i32_0, %c0_i32_1 : i32, i32, i32
  }
  func.func @transform_2(%arg0: i32, %arg1: i32) -> (i32, i32) {
    %c0_i32 = arith.constant 0 : i32
    %c0_i32_0 = arith.constant 0 : i32
    return %arg0, %c0_i32 : i32, i32
  }
  func.func @transform_3(%arg0: i32, %arg1: i32) -> (i32, i32) {
    %c0_i32 = arith.constant 0 : i32
    %c0_i32_0 = arith.constant 0 : i32
    return %c0_i32, %arg1 : i32, i32
  }
  func.func @transform_4(%arg0: i32, %arg1: i32) -> (i32, i32) {
    %c0_i32 = arith.constant 0 : i32
    %c0_i32_0 = arith.constant 0 : i32
    return %arg0, %c0_i32 : i32, i32
  }
}

</mosaic_0001>

<bundles_post_ra>
// kernel: contrastive_loss.1
= control target key start
LH: loop header
LB: loop body
LE: loop exit
PB: predicated region body
PF: predicated region fallthrough
CT: control target
= control target key end

     0   :  { %v913_v0 = vmov 0   ;;  %v217_v51 = vlaneseq  ;;  %s1430_s2 = inlined_call_operand.vmem [shape: s32[128,1], index: 2, kind: input, shape index: {}]   ;;  %s1431_s1 = inlined_call_operand.vmem [shape: f32[1,128,128], index: 1, kind: input, shape index: {}]   ;;  %s1432_s3 = inlined_call_operand.vmem [shape: s32[1,128], index: 3, kind: input, shape index: {}]   ;;  %s1433_s0 = inlined_call_operand.vmem [shape: f32[128,128], index: 0, kind: input, shape index: {}]   ;;  %s1434_s4 = inlined_call_operand.vmem [shape: f32[128,1], index: 4, kind: output, shape index: {}]  }
   0x1   :  { %813 = vset.pattern.permute.xlu0 %v913_v0  ;;  %v274_v1 = vld [vmem:[%s1430_s2] sm:$0xff]  ;;  %v70_v2 = vld [vmem:[%s1431_s1 + $0x78] sm:$0xff]  ;;  %v69_v3 = vld [vmem:[%s1431_s1 + $0x70] sm:$0xff]  ;;  %814 = vset.pattern.permute.xlu1 %v913_v0 }
   0x2   :  { %292 = vperm.xlu0 %813, %v274_v1   ;;  %87 = vmatpush.msra.mxu0 %v70_v2  ;;  %v68_v4 = vld [vmem:[%s1431_s1 + $0x68] sm:$0xff]  ;;  %v67_v5 = vld [vmem:[%s1431_s1 + $0x60] sm:$0xff]  ;;  %v66_v7 = vld [vmem:[%s1431_s1 + $0x58] sm:$0xff]  ;;  %v1092_v53 = vshrl.u32 %v217_v51, 7  ;;  %v1096_v55 = vand.u32 127, %v217_v51 }
   0x3   :  { %764 = vmatpush.msra.mxu1 %v70_v2  ;;  %765 = vmatpush.msra.mxu2 %v70_v2  ;;  %v275_v6 = vld [vmem:[%s1430_s2 + $0x8] sm:$0xff]  ;;  %v65_v8 = vld [vmem:[%s1431_s1 + $0x50] sm:$0xff]  ;;  %v63_v10 = vld [vmem:[%s1431_s1 + $0x40] sm:$0xff] }
   0x4   :  { %766 = vmatpush.msra.mxu3 %v70_v2  ;;  %88 = vmatpush.msra.mxu0 %v69_v3  ;;  %v64_v9 = vld [vmem:[%s1431_s1 + $0x48] sm:$0xff]  ;;  %v280_v11 = vld [vmem:[%s1430_s2 + $0x30] sm:$0xff]  ;;  %v62_v12 = vld [vmem:[%s1431_s1 + $0x38] sm:$0xff]  ;;  %v229_v56 = vadd.s32 88, %v1092_v53  ;;  %v225_v62 = vadd.s32 56, %v1092_v53  ;;  %vm255_vm10 = vcmp.lt.s32.totalorder %v1096_v55, 8  ;;  %vm356_vm11 = vcmp.ne.s32.totalorder %v1092_v53, %v1096_v55 }
   0x5   :  { %767 = vmatpush.msra.mxu1 %v69_v3  ;;  %768 = vmatpush.msra.mxu2 %v69_v3  ;;  %v61_v13 = vld [vmem:[%s1431_s1 + $0x30] sm:$0xff]  ;;  %v60_v15 = vld [vmem:[%s1431_s1 + $0x28] sm:$0xff]  ;;  %v59_v16 = vld [vmem:[%s1431_s1 + $0x20] sm:$0xff] }
   0x6   :  { %769 = vmatpush.msra.mxu3 %v69_v3  ;;  %89 = vmatpush.msra.mxu0 %v68_v4  ;;  %v276_v14 = vld [vmem:[%s1430_s2 + $0x10] sm:$0xff]  ;;  %v283_v17 = vld [vmem:[%s1430_s2 + $0x48] sm:$0xff]  ;;  %v58_v18 = vld [vmem:[%s1431_s1 + $0x18] sm:$0xff]  ;;  %vm367_vm0 = vcmp.ne.s32.totalorder %v229_v56, %v1096_v55  ;;  %vm363_vm1 = vcmp.ne.s32.totalorder %v225_v62, %v1096_v55  ;;  %v233_v3 = vadd.s32 120, %v1092_v53 }
   0x7   :  { %770 = vmatpush.msra.mxu1 %v68_v4  ;;  %771 = vmatpush.msra.mxu2 %v68_v4  ;;  %v57_v19 = vld [vmem:[%s1431_s1 + $0x10] sm:$0xff]  ;;  %v277_v20 = vld [vmem:[%s1430_s2 + $0x18] sm:$0xff]  ;;  %v56_v21 = vld [vmem:[%s1431_s1 + $0x8] sm:$0xff] }
   0x8   :  { %772 = vmatpush.msra.mxu3 %v68_v4  ;;  %90 = vmatpush.msra.mxu0 %v67_v5  ;;  %v55_v22 = vld [vmem:[%s1431_s1] sm:$0xff]  ;;  %v281_v29 = vld [vmem:[%s1430_s2 + $0x38] sm:$0xff]  ;;  %v72_v30 = vld [vmem:[%s1433_s0 + $0x8] sm:$0xff]  ;;  %vm371_vm6 = vcmp.ne.s32.totalorder %v233_v3, %v1096_v55 }
   0x9   :  { %773 = vmatpush.msra.mxu1 %v67_v5  ;;  %774 = vmatpush.msra.mxu2 %v67_v5  ;;  %v71_v23 = vld [vmem:[%s1433_s0] sm:$0xff]  ;;  %v76_v31 = vld [vmem:[%s1433_s0 + $0x28] sm:$0xff]  ;;  %v289_v34 = vld [vmem:[%s1430_s2 + $0x78] sm:$0xff] }
   0xa   :  { %775 = vmatpush.msra.mxu3 %v67_v5  ;;  %295 = vperm.xlu0 %813, %v275_v6   ;;  %v75_v24 = vld [vmem:[%s1433_s0 + $0x20] sm:$0xff]  ;;  %v80_v32 = vld [vmem:[%s1433_s0 + $0x48] sm:$0xff]  ;;  %v284_v36 = vld [vmem:[%s1430_s2 + $0x50] sm:$0xff] }
   0xb   :  { %91 = vmatpush.msra.mxu0 %v66_v7  ;;  %776 = vmatpush.msra.mxu1 %v66_v7  ;;  %v79_v25 = vld [vmem:[%s1433_s0 + $0x40] sm:$0xff]  ;;  %v84_v33 = vld [vmem:[%s1433_s0 + $0x68] sm:$0xff]  ;;  %v73_v37 = vld [vmem:[%s1433_s0 + $0x10] sm:$0xff] }
   0xc   :  { %777 = vmatpush.msra.mxu2 %v66_v7  ;;  %778 = vmatpush.msra.mxu3 %v66_v7  ;;  %v83_v26 = vld [vmem:[%s1433_s0 + $0x60] sm:$0xff]  ;;  %v279_v35 = vld [vmem:[%s1430_s2 + $0x28] sm:$0xff]  ;;  %v77_v38 = vld [vmem:[%s1433_s0 + $0x30] sm:$0xff] }
   0xd   :  { %92 = vmatpush.msra.mxu0 %v65_v8  ;;  %779 = vmatpush.msra.mxu1 %v65_v8  ;;  %v286_v27 = vld [vmem:[%s1430_s2 + $0x60] sm:$0xff]  ;;  %v81_v39 = vld [vmem:[%s1433_s0 + $0x50] sm:$0xff]  ;;  %v287_v42 = vld [vmem:[%s1430_s2 + $0x68] sm:$0xff] }
   0xe   :  { %780 = vmatpush.msra.mxu2 %v65_v8  ;;  %781 = vmatpush.msra.mxu3 %v65_v8  ;;  %v278_v28 = vld [vmem:[%s1430_s2 + $0x20] sm:$0xff]  ;;  %v85_v40 = vld [vmem:[%s1433_s0 + $0x70] sm:$0xff]  ;;  %v74_v43 = vld [vmem:[%s1433_s0 + $0x18] sm:$0xff] }
   0xf   :  { %93 = vmatpush.msra.mxu0 %v64_v9  ;;  %782 = vmatpush.msra.mxu1 %v64_v9  ;;  %v282_v41 = vld [vmem:[%s1430_s2 + $0x40] sm:$0xff]  ;;  %v78_v44 = vld [vmem:[%s1433_s0 + $0x38] sm:$0xff]  ;;  %v288_v48 = vld [vmem:[%s1430_s2 + $0x70] sm:$0xff] }
  0x10   :  { %783 = vmatpush.msra.mxu2 %v64_v9  ;;  %784 = vmatpush.msra.mxu3 %v64_v9  ;;  %v82_v45 = vld [vmem:[%s1433_s0 + $0x58] sm:$0xff]  ;;  %v1114_v63 = vld [vmem:[%s1432_s3] ss:$0 sm:$0xff] }
  0x11   :  { %94 = vmatpush.msra.mxu0 %v63_v10  ;;  %785 = vmatpush.msra.mxu1 %v63_v10  ;;  %v86_v46 = vld [vmem:[%s1433_s0 + $0x78] sm:$0xff] }
  0x12   :  { %786 = vmatpush.msra.mxu2 %v63_v10  ;;  %787 = vmatpush.msra.mxu3 %v63_v10  ;;  %v285_v47 = vld [vmem:[%s1430_s2 + $0x58] sm:$0xff] }
  0x13   :  { %310 = vperm.xlu0 %813, %v280_v11   ;;  %95 = vmatpush.msra.mxu0 %v62_v12 }
  0x14   :  { %788 = vmatpush.msra.mxu1 %v62_v12  ;;  %789 = vmatpush.msra.mxu2 %v62_v12 }
  0x15   :  { %790 = vmatpush.msra.mxu3 %v62_v12  ;;  %96 = vmatpush.msra.mxu0 %v61_v13 }
  0x16   :  { %791 = vmatpush.msra.mxu1 %v61_v13  ;;  %792 = vmatpush.msra.mxu2 %v61_v13 }
  0x17   :  { %793 = vmatpush.msra.mxu3 %v61_v13  ;;  %298 = vperm.xlu1 %814, %v276_v14  }
  0x18   :  { %97 = vmatpush.msra.mxu0 %v60_v15  ;;  %794 = vmatpush.msra.mxu1 %v60_v15 }
  0x19   :  { %795 = vmatpush.msra.mxu2 %v60_v15  ;;  %796 = vmatpush.msra.mxu3 %v60_v15 }
  0x1a   :  { %98 = vmatpush.msra.mxu0 %v59_v16  ;;  %797 = vmatpush.msra.mxu1 %v59_v16 }
  0x1b   :  { %798 = vmatpush.msra.mxu2 %v59_v16  ;;  %799 = vmatpush.msra.mxu3 %v59_v16 }
  0x1c   :  { %319 = vperm.xlu0 %813, %v283_v17   ;;  %99 = vmatpush.msra.mxu0 %v58_v18 }
  0x1d   :  { %800 = vmatpush.msra.mxu1 %v58_v18  ;;  %801 = vmatpush.msra.mxu2 %v58_v18 }
  0x1e   :  { %802 = vmatpush.msra.mxu3 %v58_v18  ;;  %100 = vmatpush.msra.mxu0 %v57_v19 }
  0x1f   :  { %803 = vmatpush.msra.mxu1 %v57_v19  ;;  %804 = vmatpush.msra.mxu2 %v57_v19 }
  0x20   :  { %805 = vmatpush.msra.mxu3 %v57_v19  ;;  %301 = vperm.xlu1 %814, %v277_v20  }
  0x21   :  { %101 = vmatpush.msra.mxu0 %v56_v21  ;;  %806 = vmatpush.msra.mxu1 %v56_v21 }
  0x22   :  { %807 = vmatpush.msra.mxu2 %v56_v21  ;;  %808 = vmatpush.msra.mxu3 %v56_v21 }
  0x23   :  { %102 = vmatpush.msra.mxu0 %v55_v22  ;;  %809 = vmatpush.msra.mxu1 %v55_v22 }
  0x24   :  { %810 = vmatpush.msra.mxu2 %v55_v22  ;;  %811 = vmatpush.msra.mxu3 %v55_v22 }
  0x25   :  { %103 = vmatmul.f32.vlgmr.msra.gmra.mxu0 %v71_v23  ;;  %115 = vmatmul.f32.vlgmr.msra.gmra.mxu1 %v75_v24 }
  0x26   :  { %127 = vmatmul.f32.vlgmr.msra.gmra.mxu2 %v79_v25  ;;  %139 = vmatmul.f32.vlgmr.msra.gmra.mxu3 %v83_v26  ;;  %v230_v26 = vadd.s32 96, %v1092_v53 }
  0x27   :  { %328 = vperm.xlu0 %813, %v286_v27   ;;  %815 = vset.pattern.permute.xlu2 %v913_v0  ;;  %v222_v27 = vadd.s32 32, %v1092_v53 }
  0x28   :  { %304 = vperm.xlu2 %815, %v278_v28   ;;  %313 = vperm.xlu1 %814, %v281_v29  }
  0x29   :  { %vm360_vm14 = vcmp.ne.s32.totalorder %v222_v27, %v1096_v55 }
  0x2d   :  { %106 = vmatmul.f32.gmra.mxu0 %v72_v30  ;;  %118 = vmatmul.f32.gmra.mxu1 %v76_v31 }
  0x2e   :  { %130 = vmatmul.f32.gmra.mxu2 %v80_v32  ;;  %142 = vmatmul.f32.gmra.mxu3 %v84_v33  ;;  %v226_v32 = vadd.s32 64, %v1092_v53 }
  0x2f   :  { %337 = vperm.xlu0 %813, %v289_v34  }
  0x30   :  { %307 = vperm.xlu2 %815, %v279_v35   ;;  %322 = vperm.xlu1 %814, %v284_v36  }
  0x35   :  { %109 = vmatmul.f32.gmra.mxu0 %v73_v37  ;;  %121 = vmatmul.f32.gmra.mxu1 %v77_v38 }
  0x36   :  { %133 = vmatmul.f32.gmra.mxu2 %v81_v39  ;;  %145 = vmatmul.f32.gmra.mxu3 %v85_v40 }
  0x38   :  { %316 = vperm.xlu2 %815, %v282_v41   ;;  %331 = vperm.xlu1 %814, %v287_v42  }
  0x3d   :  { %112 = vmatmul.f32.gmra.mxu0 %v74_v43  ;;  %124 = vmatmul.f32.gmra.mxu1 %v78_v44 }
  0x3e   :  { %136 = vmatmul.f32.gmra.mxu2 %v82_v45  ;;  %148 = vmatmul.f32.gmra.mxu3 %v86_v46  ;;  %v219_v45 = vadd.s32 8, %v1092_v53 }
  0x40   :  { %325 = vperm.xlu2 %815, %v285_v47  }
  0x48   :  { %334 = vperm.xlu2 %815, %v288_v48  }
  0x74   :  { %v1086_v49 = vpop.permute.xlu0 %292 }
  0x75   :  { %vm340_vm9 = vcmp.eq.s32.totalorder %v1086_v49, %v1114_v63 }
  0x76   :  { %vm372_vm12 = vmand %vm340_vm9, %vm356_vm11 }
  0x7c   :  { %v1088_v50 = vpop.permute.xlu0 %295 }
  0x82   :  { %v1090_v52 = vpop.permute.xlu2 %304 }
  0x83   :  { %vm344_vm13 = vcmp.eq.s32.totalorder %v1090_v52, %v1114_v63 }
  0x84   :  { %vm376_vm11 = vmand %vm344_vm13, %vm360_vm14  ;;  %vm357_vm14 = vcmp.ne.s32.totalorder %v219_v45, %v1096_v55 }
  0x85   :  { %v1094_v54 = vpop.permute.xlu0 %310 }
  0x89   :  { %v1100_v57 = vpop.permute.xlu1 %298 }
  0x8a   :  { %v1102_v58 = vpop.permute.xlu2 %307 }
  0x8e   :  { %v1104_v59 = vpop.permute.xlu0 %319 }
  0x92   :  { %v1106_v60 = vpop.permute.xlu2 %316  ;;  %v1108_v61 = vpop.permute.xlu1 %301 }
  0x99   :  { %v1116_v0 = vpop.permute.xlu0 %328 }
  0x9a   :  { %v1119_v1 = vpop.permute.xlu2 %325  ;;  %v1121_v2 = vpop.permute.xlu1 %313  ;;  %vm352_vm15 = vcmp.eq.s32.totalorder %v1116_v0, %v1114_v63 }
  0x9b   :  { %vm351_vm2 = vcmp.eq.s32.totalorder %v1119_v1, %v1114_v63  ;;  %vm347_vm3 = vcmp.eq.s32.totalorder %v1121_v2, %v1114_v63 }
  0x9c   :  { %vm1131_vm4 = vmand %vm347_vm3, %vm363_vm1  ;;  %vm348_vm1 = vcmp.eq.s32.totalorder %v1106_v60, %v1114_v63 }
  0x9d   :  { %vm1140_vm5 = vmand %vm351_vm2, %vm367_vm0  ;;  %vm368_vm0 = vcmp.ne.s32.totalorder %v230_v26, %v1096_v55  ;;  %v231_v26 = vadd.s32 104, %v1092_v53 }
  0xa1   :  { %v1145_v6 = vpop.permute.xlu0 %337 }
  0xa2   :  { %vm1435_vm7 = vcmp.eq.s32.totalorder %v1145_v6, %v1114_v63  ;;  %v104_v7 = vpop.f32.mrf.mxu0  ;;  %v116_v8 = vpop.f32.mrf.mxu1 }
  0xa3   :  { %v748_v9 = vclamps-f32 %v104_v7, 20.0  ;;  %v752_v10 = vclamps-f32 %v116_v8, 20.0  ;;  %vm1152_vm8 = vmand %vm1435_vm7, %vm371_vm6  ;;  %vm364_vm6 = vcmp.ne.s32.totalorder %v226_v32, %v1096_v55  ;;  %v1208_v8 = vpop.permute.xlu1 %322 }
  0xa4   :  { %vm380_vm7 = vmand %vm348_vm1, %vm364_vm6 }
  0xa5   :  { %v184_v12 = vmul.f32 1.442695, %v748_v9  ;;  %v192_v13 = vmul.f32 1.442695, %v752_v10 }
  0xa7   :  { %817 = vpow2.f32 %v184_v12 }
  0xa8   :  { %819 = vpow2.f32 %v192_v13 }
  0xa9   :  { %v128_v14 = vpop.f32.mrf.mxu2  ;;  %v140_v15 = vpop.f32.mrf.mxu3 }
  0xaa   :  { %v756_v16 = vclamps-f32 %v128_v14, 20.0  ;;  %v760_v17 = vclamps-f32 %v140_v15, 20.0  ;;  %v107_v18 = vpop.f32.mrf.mxu0  ;;  %v119_v19 = vpop.f32.mrf.mxu1  ;;  %v223_v14 = vadd.s32 40, %v1092_v53 }
  0xab   :  { %v749_v22 = vclamps-f32 %v107_v18, 20.0  ;;  %v753_v36 = vclamps-f32 %v119_v19, 20.0  ;;  %v1237_v32 = vpop.permute.xlu1 %331 }
  0xac   :  { %v200_v20 = vmul.f32 1.442695, %v756_v16  ;;  %v208_v21 = vmul.f32 1.442695, %v760_v17 }
  0xad   :  { %v818_v23 = vpop.eup %817  ;;  %v186_v30 = vmul.f32 1.442695, %v749_v22  ;;  %v194_v41 = vmul.f32 1.442695, %v753_v36 }
  0xae   :  { %v820_v24 = vpop.eup %819  ;;  %821 = vpow2.f32 %v200_v20  ;;  %v258_v25 = vsel %vm255_vm10, %v818_v23, 0.0 }
  0xaf   :  { %823 = vpow2.f32 %v208_v21  ;;  %v262_v28 = vsel %vm255_vm10, %v820_v24, 0.0  ;;  %v388_v29 = vsel %vm372_vm12, %v258_v25, 0.0  ;;  %vm384_vm12 = vmand %vm352_vm15, %vm368_vm0  ;;  %v404_v13 = vsel %vm340_vm9, 0.0, %v258_v25 }
  0xb0   :  { %v408_v31 = vsel %vm344_vm13, 0.0, %v262_v28  ;;  %535 = vadd.xlane.f32.xlu1 %v388_v29  ;;  %825 = vpow2.f32 %v186_v30  ;;  %v392_v43 = vsel %vm376_vm11, %v262_v28, 0.0  ;;  %vm341_vm13 = vcmp.eq.s32.totalorder %v1088_v50, %v1114_v63 }
  0xb1   :  { %v131_v33 = vpop.f32.mrf.mxu2  ;;  %v143_v34 = vpop.f32.mrf.mxu3  ;;  %607 = vadd.xlane.f32.xlu2 %v408_v31  ;;  %827 = vpow2.f32 %v194_v41  ;;  %vm345_vm9 = vcmp.eq.s32.totalorder %v1102_v58, %v1114_v63  ;;  %vm361_vm0 = vcmp.ne.s32.totalorder %v223_v14, %v1096_v55  ;;  %v227_v25 = vadd.s32 72, %v1092_v53 }
  0xb2   :  { %v1176_v35 = vpop.f32.mrf.mxu1  ;;  %v757_v51 = vclamps-f32 %v131_v33, 20.0  ;;  %v761_v56 = vclamps-f32 %v143_v34, 20.0  ;;  %v110_v15 = vpop.f32.mrf.mxu0  ;;  %vm353_vm11 = vcmp.eq.s32.totalorder %v1237_v32, %v1114_v63 }
  0xb3   :  { %v750_v20 = vclamps-f32 %v110_v15, 20.0  ;;  %vm365_vm6 = vcmp.ne.s32.totalorder %v227_v25, %v1096_v55  ;;  %v224_v15 = vadd.s32 48, %v1092_v53 }
  0xb4   :  { %v822_v37 = vpop.eup %821  ;;  %v202_v9 = vmul.f32 1.442695, %v757_v51  ;;  %v210_v10 = vmul.f32 1.442695, %v761_v56 }
  0xb5   :  { %v824_v38 = vpop.eup %823  ;;  %v266_v39 = vsel %vm255_vm10, %v822_v37, 0.0  ;;  %v188_v28 = vmul.f32 1.442695, %v750_v20 }
  0xb6   :  { %v270_v40 = vsel %vm255_vm10, %v824_v38, 0.0  ;;  %v396_v44 = vsel %vm380_vm7, %v266_v39, 0.0  ;;  %v826_v48 = vpop.eup %825  ;;  %v412_v12 = vsel %vm348_vm1, 0.0, %v266_v39  ;;  %vm373_vm7 = vmand %vm341_vm13, %vm357_vm14  ;;  %v754_v38 = vclamps-f32 %v1176_v35, 20.0 }
  0xb7   :  { %v400_v42 = vsel %vm384_vm12, %v270_v40, 0.0  ;;  %v1206_v7 = vsel %vm255_vm10, %v826_v48, 0.0  ;;  %v828_v17 = vpop.eup %827  ;;  %v416_v30 = vsel %vm352_vm15, 0.0, %v270_v40  ;;  %vm377_vm1 = vmand %vm345_vm9, %vm361_vm0  ;;  %vm349_vm15 = vcmp.eq.s32.totalorder %v1104_v59, %v1114_v63 }
  0xb8   :  { %559 = vadd.xlane.f32.xlu0 %v400_v42  ;;  %543 = vadd.xlane.f32.xlu1 %v392_v43  ;;  %v389_v16 = vsel %vm373_vm7, %v1206_v7, 0.0  ;;  %v263_v24 = vsel %vm255_vm10, %v828_v17, 0.0  ;;  %vm369_vm12 = vcmp.ne.s32.totalorder %v231_v26, %v1096_v55  ;;  %v220_v42 = vadd.s32 16, %v1092_v53 }
  0xb9   :  { %v1199_v46 = vpop.f32.mrf.mxu2  ;;  %v146_v47 = vpop.f32.mrf.mxu3  ;;  %551 = vadd.xlane.f32.xlu2 %v396_v44  ;;  %v409_v29 = vsel %vm345_vm9, 0.0, %v263_v24  ;;  %v393_v34 = vsel %vm377_vm1, %v263_v24, 0.0  ;;  %v232_v43 = vadd.s32 112, %v1092_v53  ;;  %v196_v45 = vmul.f32 1.442695, %v754_v38  ;;  %vm385_vm14 = vmand %vm353_vm11, %vm369_vm12 }
  0xba   :  { %v125_v52 = vpop.f32.mrf.mxu1  ;;  %v762_v21 = vclamps-f32 %v146_v47, 20.0  ;;  %v758_v40 = vclamps-f32 %v1199_v46, 20.0  ;;  %vm1442_vm7 = vcmp.eq.s32.totalorder %v1145_v6, %v1114_v63  ;;  %vm362_vm12 = vcmp.ne.s32.totalorder %v224_v15, %v1096_v55 }
  0xbb   :  { %v755_v62 = vclamps-f32 %v125_v52, 20.0  ;;  %vm370_vm9 = vcmp.ne.s32.totalorder %v232_v43, %v1096_v55 }
  0xbc   :  { %v212_v33 = vmul.f32 1.442695, %v762_v21  ;;  %v204_v1 = vmul.f32 1.442695, %v758_v40  ;;  %v228_v21 = vadd.s32 80, %v1092_v53 }
  0xbd   :  { %v198_v3 = vmul.f32 1.442695, %v755_v62 }
  0xbf   :  { %829 = vpow2.f32 %v198_v3  ;;  %v405_v3 = vsel %vm341_vm13, 0.0, %v1206_v7 }
  0xc0   :  { %615 = vadd.xlane.f32.xlu0 %v412_v12  ;;  %599 = vadd.xlane.f32.xlu1 %v404_v13  ;;  %831 = vpow2.f32 %v202_v9  ;;  %v113_v12 = vpop.f32.mrf.mxu0 }
  0xc1   :  { %v137_v18 = vpop.f32.mrf.mxu2  ;;  %v149_v60 = vpop.f32.mrf.mxu3  ;;  %537 = vadd.xlane.f32.xlu2 %v389_v16  ;;  %833 = vpow2.f32 %v210_v10  ;;  %v751_v6 = vclamps-f32 %v113_v12, 20.0 }
  0xc2   :  { %v759_v19 = vclamps-f32 %v137_v18, 20.0  ;;  %v763_v49 = vclamps-f32 %v149_v60, 20.0  ;;  %v335_v10 = vpop.permute.xlu2 %334 }
  0xc3   :  { %vm354_vm0 = vcmp.eq.s32.totalorder %v335_v10, %v1114_v63  ;;  %v190_v16 = vmul.f32 1.442695, %v751_v6 }
  0xc4   :  { %v206_v22 = vmul.f32 1.442695, %v759_v19  ;;  %v214_v23 = vmul.f32 1.442695, %v763_v49  ;;  %vm386_vm1 = vmand %vm354_vm0, %vm370_vm9 }
  0xc5   :  { %v830_v27 = vpop.eup %829 }
  0xc6   :  { %835 = vpow2.f32 %v206_v22  ;;  %v832_v31 = vpop.eup %831  ;;  %v1241_v36 = vsel %vm255_vm10, %v830_v27, 0.0  ;;  %v221_v22 = vadd.s32 24, %v1092_v53 }
  0xc7   :  { %837 = vpow2.f32 %v214_v23  ;;  %v834_v37 = vpop.eup %833  ;;  %v395_v0 = vsel %vm1131_vm4, %v1241_v36, 0.0  ;;  %v1250_v58 = vsel %vm347_vm3, 0.0, %v1241_v36  ;;  %v267_v2 = vsel %vm255_vm10, %v832_v31, 0.0  ;;  %vm381_vm3 = vmand %vm349_vm15, %vm365_vm6 }
  0xc8   :  { %609 = vadd.xlane.f32.xlu0 %v409_v29  ;;  %623 = vadd.xlane.f32.xlu1 %v416_v30  ;;  %839 = vpow2.f32 %v188_v28  ;;  %v1264_v41 = vsel %vm255_vm10, %v834_v37, 0.0  ;;  %v397_v51 = vsel %vm381_vm3, %v267_v2, 0.0  ;;  %v413_v14 = vsel %vm349_vm15, 0.0, %v267_v2 }
  0xc9   :  { %545 = vadd.xlane.f32.xlu2 %v393_v34  ;;  %841 = vpow2.f32 %v212_v33  ;;  %v401_v52 = vsel %vm385_vm14, %v1264_v41, 0.0  ;;  %vm346_vm6 = vcmp.eq.s32.totalorder %v1094_v54, %v1114_v63  ;;  %vm350_vm3 = vcmp.eq.s32.totalorder %v1208_v8, %v1114_v63 }
  0xca   :  { %843 = vpow2.f32 %v196_v45  ;;  %vm378_vm15 = vmand %vm346_vm6, %vm362_vm12  ;;  %vm366_vm14 = vcmp.ne.s32.totalorder %v228_v21, %v1096_v55  ;;  %vm727_vm4 = vcmask 7168  }
  0xcb   :  { %845 = vpow2.f32 %v204_v1  ;;  %vm382_vm9 = vmand %vm350_vm3, %vm366_vm14 }
  0xcc   :  { %v836_v39 = vpop.eup %835  ;;  %847 = vpow2.f32 %v190_v16 }
  0xcd   :  { %v838_v35 = vpop.eup %837  ;;  %v1273_v44 = vsel %vm255_vm10, %v836_v39, 0.0 }
  0xce   :  { %v1280_v46 = vsel %vm255_vm10, %v838_v35, 0.0  ;;  %v1286_v47 = vsel %vm351_vm2, 0.0, %v1273_v44  ;;  %v399_v48 = vsel %vm1140_vm5, %v1273_v44, 0.0  ;;  %v840_v9 = vpop.eup %839  ;;  %vm342_vm2 = vcmp.eq.s32.totalorder %v1100_v57, %v1114_v63 }
  0xcf   :  { %v403_v56 = vsel %vm1152_vm8, %v1280_v46, 0.0  ;;  %v1299_v62 = vsel %vm1442_vm7, 0.0, %v1280_v46  ;;  %v842_v11 = vpop.eup %841  ;;  %vm358_vm8 = vcmp.ne.s32.totalorder %v220_v42, %v1096_v55  ;;  %v260_v50 = vsel %vm255_vm10, %v840_v9, 0.0 }
  0xd0   :  { %553 = vadd.xlane.f32.xlu0 %v397_v51  ;;  %561 = vadd.xlane.f32.xlu1 %v401_v52  ;;  %v272_v7 = vsel %vm255_vm10, %v842_v11, 0.0  ;;  %vm374_vm13 = vmand %vm342_vm2, %vm358_vm8  ;;  %v844_v18 = vpop.eup %843  ;;  %vm343_vm7 = vcmp.eq.s32.totalorder %v1108_v61, %v1114_v63  ;;  %vm359_vm8 = vcmp.ne.s32.totalorder %v221_v22, %v1096_v55  ;;  %v406_v24 = vsel %vm342_vm2, 0.0, %v260_v50 }
  0xd1   :  { %601 = vadd.xlane.f32.xlu2 %v405_v3  ;;  %v390_v13 = vsel %vm374_vm13, %v260_v50, 0.0  ;;  %v402_v17 = vsel %vm386_vm1, %v272_v7, 0.0  ;;  %v846_v60 = vpop.eup %845  ;;  %v264_v59 = vsel %vm255_vm10, %v844_v18, 0.0  ;;  %vm375_vm13 = vmand %vm343_vm7, %vm359_vm8  ;;  %v418_v57 = vsel %vm354_vm0, 0.0, %v272_v7 }
  0xd2   :  { %v268_v19 = vsel %vm255_vm10, %v846_v60, 0.0  ;;  %v394_v49 = vsel %vm378_vm15, %v264_v59, 0.0  ;;  %v410_v20 = vsel %vm346_vm6, 0.0, %v264_v59  ;;  %v848_v23 = vpop.eup %847  ;;  %v417_v61 = vsel %vm353_vm11, 0.0, %v1264_v41 }
  0xd3   :  { %v414_v54 = vsel %vm350_vm3, 0.0, %v268_v19  ;;  %v261_v8 = vsel %vm255_vm10, %v848_v23, 0.0  ;;  %v398_v25 = vsel %vm382_vm9, %v268_v19, 0.0 }
  0xd4   :  { %v391_v53 = vsel %vm375_vm13, %v261_v8, 0.0  ;;  %v407_v55 = vsel %vm343_vm7, 0.0, %v261_v8 }
  0xd8   :  { %539 = vadd.xlane.f32.xlu0 %v390_v13  ;;  %617 = vadd.xlane.f32.xlu1 %v413_v14 }
  0xd9   :  { %563 = vadd.xlane.f32.xlu2 %v402_v17 }
  0xe0   :  { %547 = vadd.xlane.f32.xlu0 %v394_v49  ;;  %611 = vadd.xlane.f32.xlu1 %v410_v20 }
  0xe1   :  { %619 = vadd.xlane.f32.xlu2 %v414_v54 }
  0xe8   :  { %603 = vadd.xlane.f32.xlu0 %v406_v24  ;;  %555 = vadd.xlane.f32.xlu1 %v398_v25 }
  0xe9   :  { %541 = vadd.xlane.f32.xlu2 %v391_v53 }
  0xf0   :  { %565 = vadd.xlane.f32.xlu0 %v403_v56  ;;  %549 = vadd.xlane.f32.xlu1 %v395_v0 }
  0xf1   :  { %613 = vadd.xlane.f32.xlu2 %v1250_v58 }
  0xf8   :  { %621 = vadd.xlane.f32.xlu0 %v1286_v47  ;;  %605 = vadd.xlane.f32.xlu1 %v407_v55 }
  0xf9   :  { %557 = vadd.xlane.f32.xlu2 %v399_v48 }
 0x100   :  { %627 = vadd.xlane.f32.xlu0 %v418_v57  ;;  %629 = vadd.xlane.f32.xlu1 %v1299_v62 }
 0x101   :  { %625 = vadd.xlane.f32.xlu2 %v417_v61 }
 0x123   :  { %v536_v4 = vpop.xlane.xlu1 %535 }
 0x124   :  { %v608_v26 = vpop.xlane.xlu2 %607  ;;  %v567_v33 = vadd.f32 1e-10, %v536_v4 }
 0x125   :  { %v635_v27 = vadd.f32 1e-10, %v608_v26 }
 0x127   :  { %849 = vlog2.f32 %v635_v27 }
 0x12b   :  { %v560_v28 = vpop.xlane.xlu0 %559  ;;  %v544_v5 = vpop.xlane.xlu1 %543 }
 0x12c   :  { %v552_v29 = vpop.xlane.xlu2 %551  ;;  %v571_v30 = vadd.f32 1e-10, %v544_v5  ;;  %v579_v40 = vadd.f32 1e-10, %v560_v28 }
 0x12d   :  { %v575_v31 = vadd.f32 1e-10, %v552_v29  ;;  %v850_v37 = vpop.eup %849 }
 0x12e   :  { %851 = vlog2.f32 %v571_v30  ;;  %v688_v38 = vmul.f32 0.6931472, %v850_v37 }
 0x12f   :  { %853 = vlog2.f32 %v575_v31 }
 0x130   :  { %855 = vlog2.f32 %v567_v33 }
 0x133   :  { %v616_v34 = vpop.xlane.xlu0 %615  ;;  %v600_v36 = vpop.xlane.xlu1 %599 }
 0x134   :  { %v639_v0 = vadd.f32 1e-10, %v616_v34  ;;  %v631_v58 = vadd.f32 1e-10, %v600_v36  ;;  %v538_v63 = vpop.xlane.xlu2 %537  ;;  %v852_v32 = vpop.eup %851 }
 0x135   :  { %v656_v39 = vmul.f32 0.6931472, %v852_v32  ;;  %v854_v41 = vpop.eup %853  ;;  %v568_v10 = vadd.f32 1e-10, %v538_v63 }
 0x136   :  { %857 = vlog2.f32 %v639_v0  ;;  %v856_v35 = vpop.eup %855  ;;  %v664_v51 = vmul.f32 0.6931472, %v854_v41 }
 0x137   :  { %859 = vlog2.f32 %v631_v58  ;;  %v715_v2 = vsub.f32 %v656_v39, %v688_v38  ;;  %v648_v62 = vmul.f32 0.6931472, %v856_v35 }
 0x138   :  { %861 = vlog2.f32 %v579_v40 }
 0x139   :  { %732 = vst.msk [vmem:[%s1434_s4 + $0x20] sm:$0xff] %vm727_vm4, %v715_v2 }
 0x13b   :  { %v610_v42 = vpop.xlane.xlu0 %609  ;;  %v624_v43 = vpop.xlane.xlu1 %623 }
 0x13c   :  { %v858_v44 = vpop.eup %857  ;;  %v636_v45 = vadd.f32 1e-10, %v610_v42  ;;  %v643_v46 = vadd.f32 1e-10, %v624_v43  ;;  %v546_v47 = vpop.xlane.xlu2 %545 }
 0x13d   :  { %v860_v48 = vpop.eup %859  ;;  %v696_v52 = vmul.f32 0.6931472, %v858_v44  ;;  %v572_v56 = vadd.f32 1e-10, %v546_v47 }
 0x13e   :  { %v680_v1 = vmul.f32 0.6931472, %v860_v48  ;;  %863 = vlog2.f32 %v636_v45  ;;  %v862_v12 = vpop.eup %861 }
 0x13f   :  { %v719_v3 = vsub.f32 %v664_v51, %v696_v52  ;;  %865 = vlog2.f32 %v643_v46  ;;  %v672_v16 = vmul.f32 0.6931472, %v862_v12 }
 0x140   :  { %v711_v9 = vsub.f32 %v648_v62, %v680_v1  ;;  %867 = vlog2.f32 %v572_v56 }
 0x141   :  { %736 = vst.msk [vmem:[%s1434_s4 + $0x40] sm:$0xff] %vm727_vm4, %v719_v3  ;;  %869 = vlog2.f32 %v568_v10 }
 0x142   :  { %728 = vst.msk [vmem:[%s1434_s4] sm:$0xff] %vm727_vm4, %v711_v9 }
 0x143   :  { %v554_v11 = vpop.xlane.xlu0 %553  ;;  %v1372_v6 = vpop.xlane.xlu1 %561 }
 0x144   :  { %v864_v50 = vpop.eup %863  ;;  %v602_v7 = vpop.xlane.xlu2 %601  ;;  %v576_v49 = vadd.f32 1e-10, %v554_v11 }
 0x145   :  { %v866_v13 = vpop.eup %865  ;;  %v632_v14 = vadd.f32 1e-10, %v602_v7  ;;  %v690_v18 = vmul.f32 0.6931472, %v864_v50 }
 0x146   :  { %v868_v15 = vpop.eup %867  ;;  %v704_v17 = vmul.f32 0.6931472, %v866_v13 }
 0x147   :  { %v658_v60 = vmul.f32 0.6931472, %v868_v15  ;;  %871 = vlog2.f32 %v632_v14  ;;  %v870_v54 = vpop.eup %869 }
 0x148   :  { %v723_v59 = vsub.f32 %v672_v16, %v704_v17  ;;  %873 = vlog2.f32 %v576_v49  ;;  %v650_v24 = vmul.f32 0.6931472, %v870_v54  ;;  %v580_v16 = vadd.f32 1e-10, %v1372_v6 }
 0x149   :  { %v716_v19 = vsub.f32 %v658_v60, %v690_v18 }
 0x14a   :  { %740 = vst.msk [vmem:[%s1434_s4 + $0x60] sm:$0xff] %vm727_vm4, %v723_v59 }
 0x14b   :  { %733 = vst.msk [vmem:[%s1434_s4 + $0x28] sm:$0xff] %vm727_vm4, %v716_v19  ;;  %v540_v20 = vpop.xlane.xlu0 %539  ;;  %v618_v21 = vpop.xlane.xlu1 %617 }
 0x14c   :  { %v640_v22 = vadd.f32 1e-10, %v618_v21  ;;  %v1382_v23 = vpop.xlane.xlu2 %563  ;;  %v569_v30 = vadd.f32 1e-10, %v540_v20 }
 0x14d   :  { %v872_v8 = vpop.eup %871  ;;  %v581_v18 = vadd.f32 1e-10, %v1382_v23 }
 0x14e   :  { %v682_v25 = vmul.f32 0.6931472, %v872_v8  ;;  %875 = vlog2.f32 %v640_v22  ;;  %v874_v55 = vpop.eup %873 }
 0x14f   :  { %v666_v5 = vmul.f32 0.6931472, %v874_v55 }
 0x150   :  { %v712_v53 = vsub.f32 %v650_v24, %v682_v25 }
 0x152   :  { %729 = vst.msk [vmem:[%s1434_s4 + $0x8] sm:$0xff] %vm727_vm4, %v712_v53 }
 0x153   :  { %v548_v57 = vpop.xlane.xlu0 %547  ;;  %v612_v61 = vpop.xlane.xlu1 %611 }
 0x154   :  { %v573_v4 = vadd.f32 1e-10, %v548_v57  ;;  %v637_v26 = vadd.f32 1e-10, %v612_v61  ;;  %v620_v27 = vpop.xlane.xlu2 %619  ;;  %v876_v28 = vpop.eup %875 }
 0x155   :  { %v698_v29 = vmul.f32 0.6931472, %v876_v28  ;;  %v641_v33 = vadd.f32 1e-10, %v620_v27 }
 0x156   :  { %877 = vlog2.f32 %v573_v4 }
 0x157   :  { %879 = vlog2.f32 %v637_v26  ;;  %v720_v31 = vsub.f32 %v666_v5, %v698_v29 }
 0x158   :  { %881 = vlog2.f32 %v569_v30 }
 0x159   :  { %737 = vst.msk [vmem:[%s1434_s4 + $0x48] sm:$0xff] %vm727_vm4, %v720_v31  ;;  %883 = vlog2.f32 %v641_v33 }
 0x15b   :  { %v604_v34 = vpop.xlane.xlu0 %603  ;;  %v556_v36 = vpop.xlane.xlu1 %555 }
 0x15c   :  { %v878_v37 = vpop.eup %877  ;;  %v633_v0 = vadd.f32 1e-10, %v604_v34  ;;  %v577_v58 = vadd.f32 1e-10, %v556_v36  ;;  %v542_v63 = vpop.xlane.xlu2 %541 }
 0x15d   :  { %v880_v32 = vpop.eup %879  ;;  %v660_v38 = vmul.f32 0.6931472, %v878_v37  ;;  %v570_v3 = vadd.f32 1e-10, %v542_v63 }
 0x15e   :  { %v692_v39 = vmul.f32 0.6931472, %v880_v32  ;;  %885 = vlog2.f32 %v633_v0  ;;  %v882_v2 = vpop.eup %881 }
 0x15f   :  { %887 = vlog2.f32 %v577_v58  ;;  %v884_v41 = vpop.eup %883  ;;  %v652_v47 = vmul.f32 0.6931472, %v882_v2 }
 0x160   :  { %v717_v40 = vsub.f32 %v660_v38, %v692_v39  ;;  %v700_v52 = vmul.f32 0.6931472, %v884_v41 }
 0x162   :  { %734 = vst.msk [vmem:[%s1434_s4 + $0x30] sm:$0xff] %vm727_vm4, %v717_v40 }
 0x163   :  { %v566_v35 = vpop.xlane.xlu0 %565  ;;  %v550_v42 = vpop.xlane.xlu1 %549 }
 0x164   :  { %v886_v43 = vpop.eup %885  ;;  %v574_v44 = vadd.f32 1e-10, %v550_v42  ;;  %v614_v45 = vpop.xlane.xlu2 %613  ;;  %v582_v60 = vadd.f32 1e-10, %v566_v35 }
 0x165   :  { %v888_v46 = vpop.eup %887  ;;  %v684_v48 = vmul.f32 0.6931472, %v886_v43  ;;  %v638_v51 = vadd.f32 1e-10, %v614_v45 }
 0x166   :  { %v668_v56 = vmul.f32 0.6931472, %v888_v46  ;;  %889 = vlog2.f32 %v574_v44 }
 0x167   :  { %v713_v62 = vsub.f32 %v652_v47, %v684_v48  ;;  %891 = vlog2.f32 %v638_v51 }
 0x168   :  { %v721_v1 = vsub.f32 %v668_v56, %v700_v52  ;;  %893 = vlog2.f32 %v570_v3 }
 0x169   :  { %730 = vst.msk [vmem:[%s1434_s4 + $0x10] sm:$0xff] %vm727_vm4, %v713_v62 }
 0x16a   :  { %738 = vst.msk [vmem:[%s1434_s4 + $0x50] sm:$0xff] %vm727_vm4, %v721_v1 }
 0x16b   :  { %v622_v9 = vpop.xlane.xlu0 %621  ;;  %v606_v10 = vpop.xlane.xlu1 %605 }
 0x16c   :  { %v642_v12 = vadd.f32 1e-10, %v622_v9  ;;  %v634_v11 = vadd.f32 1e-10, %v606_v10  ;;  %v558_v50 = vpop.xlane.xlu2 %557  ;;  %v890_v7 = vpop.eup %889 }
 0x16d   :  { %v578_v13 = vadd.f32 1e-10, %v558_v50  ;;  %v892_v14 = vpop.eup %891  ;;  %v662_v15 = vmul.f32 0.6931472, %v890_v7 }
 0x16e   :  { %895 = vlog2.f32 %v642_v12  ;;  %v694_v17 = vmul.f32 0.6931472, %v892_v14  ;;  %v894_v19 = vpop.eup %893 }
 0x16f   :  { %897 = vlog2.f32 %v634_v11  ;;  %v654_v25 = vmul.f32 0.6931472, %v894_v19 }
 0x170   :  { %899 = vlog2.f32 %v578_v13  ;;  %v718_v59 = vsub.f32 %v662_v15, %v694_v17 }
 0x171   :  { %901 = vlog2.f32 %v580_v16 }
 0x172   :  { %735 = vst.msk [vmem:[%s1434_s4 + $0x38] sm:$0xff] %vm727_vm4, %v718_v59  ;;  %903 = vlog2.f32 %v581_v18 }
 0x173   :  { %v628_v49 = vpop.xlane.xlu0 %627  ;;  %v630_v20 = vpop.xlane.xlu1 %629  ;;  %905 = vlog2.f32 %v582_v60 }
 0x174   :  { %v896_v21 = vpop.eup %895  ;;  %v645_v54 = vadd.f32 1e-10, %v628_v49  ;;  %v646_v6 = vadd.f32 1e-10, %v630_v20  ;;  %v626_v22 = vpop.xlane.xlu2 %625 }
 0x175   :  { %v898_v8 = vpop.eup %897  ;;  %v644_v23 = vadd.f32 1e-10, %v626_v22  ;;  %v702_v55 = vmul.f32 0.6931472, %v896_v21 }
 0x176   :  { %v900_v24 = vpop.eup %899  ;;  %v686_v53 = vmul.f32 0.6931472, %v898_v8  ;;  %907 = vlog2.f32 %v645_v54 }
 0x177   :  { %v670_v57 = vmul.f32 0.6931472, %v900_v24  ;;  %909 = vlog2.f32 %v646_v6  ;;  %v902_v4 = vpop.eup %901 }
 0x178   :  { %v714_v61 = vsub.f32 %v654_v25, %v686_v53  ;;  %911 = vlog2.f32 %v644_v23  ;;  %v904_v27 = vpop.eup %903  ;;  %v674_v37 = vmul.f32 0.6931472, %v902_v4 }
 0x179   :  { %v722_v26 = vsub.f32 %v670_v57, %v702_v55  ;;  %v906_v28 = vpop.eup %905  ;;  %v676_v30 = vmul.f32 0.6931472, %v904_v27 }
 0x17a   :  { %731 = vst.msk [vmem:[%s1434_s4 + $0x18] sm:$0xff] %vm727_vm4, %v714_v61  ;;  %v678_v34 = vmul.f32 0.6931472, %v906_v28 }
 0x17b   :  { %739 = vst.msk [vmem:[%s1434_s4 + $0x58] sm:$0xff] %vm727_vm4, %v722_v26 }
 0x17c   :  { %v908_v5 = vpop.eup %907 }
 0x17d   :  { %v910_v29 = vpop.eup %909  ;;  %v708_v31 = vmul.f32 0.6931472, %v908_v5 }
 0x17e   :  { %v912_v33 = vpop.eup %911  ;;  %v710_v36 = vmul.f32 0.6931472, %v910_v29 }
 0x17f   :  { %v725_v0 = vsub.f32 %v676_v30, %v708_v31  ;;  %v706_v58 = vmul.f32 0.6931472, %v912_v33 }
 0x180   :  { %v726_v63 = vsub.f32 %v678_v34, %v710_v36 }
 0x181   :  { %742 = vst.msk [vmem:[%s1434_s4 + $0x70] sm:$0xff] %vm727_vm4, %v725_v0  ;;  %v724_v32 = vsub.f32 %v674_v37, %v706_v58 }
 0x182   :  { %743 = vst.msk [vmem:[%s1434_s4 + $0x78] sm:$0xff] %vm727_vm4, %v726_v63 }
 0x183   :  { %741 = vst.msk [vmem:[%s1434_s4 + $0x68] sm:$0xff] %vm727_vm4, %v724_v32 }

</bundles_post_ra>
